<compile_context>
chip_gen: v7x
topology: tpu7x:2x2x1
jax: 0.10.0
libtpu: 0.0.40
codegen_flags: <defaults>
</compile_context>

<pallas_src>
import math

import jax
import jax.numpy as jnp
from jax.experimental import pallas as pl
from jax.experimental.pallas import tpu as pltpu

L2_EPS = 1e-8   # eps used inside l2_norm
RS_EPS = 1e-5   # eps used by RSNorm (running-statistics normalization)


def _l2_norm(x):
    return x * jax.lax.rsqrt(jnp.sum(x * x, axis=-1, keepdims=True) + L2_EPS)


def _round_up(x, m):
    return ((x + m - 1) // m) * m


def _vmem_capacity_bytes():
    try:
        return int(pltpu.get_tpu_info().vmem_capacity_bytes)
    except Exception:
        return 64 << 20           # conservative default (v7x per-TensorCore VMEM)


# --------------------------------------------------------------------------------------
# Kernels
# --------------------------------------------------------------------------------------

def _simba_resident_kernel(x_ref, mean_ref, invstd_ref, w_emb_ref,
                           w1_ref, w2_ref, alpha_ref, w_om_ref, w_fin_ref,
                           out_ref):
    """Weight-stationary path: all weights VMEM-resident, full network per batch tile."""
    # RSNorm (eval mode); the appended shift column has mean=0 / invstd=1 so it passes
    # through at shift_constant (reproduces torch.cat([rsnorm(x), shift])).
    x = x_ref[...]
    x_tilde = _l2_norm((x - mean_ref[...]) * invstd_ref[...])

    # Embedding (embedding scaler folded into w_emb).
    h = _l2_norm(jnp.dot(x_tilde.astype(jnp.bfloat16), w_emb_ref[...],
                         preferred_element_type=jnp.float32))

    # SimbaV2 blocks — statically unrolled, block weights indexed in resident VMEM.
    for j in range(w1_ref.shape[0]):
        hm = jnp.dot(h.astype(jnp.bfloat16), w1_ref[j],
                     preferred_element_type=jnp.float32)
        hm = jnp.maximum(hm, 0.0)                       # Scaler folded into w1 -> ReLU
        hm = jnp.dot(hm.astype(jnp.bfloat16), w2_ref[j],
                     preferred_element_type=jnp.float32)
        h_tilde = _l2_norm(hm)
        # LERP: (1-alpha)*h + alpha*h_tilde, re-projected onto the sphere.
        h = _l2_norm(h + alpha_ref[j] * (h_tilde - h))

    # Output MLP (scaler folded into w_om) + final head (lane-dense padded).
    h_out = jnp.dot(h.astype(jnp.bfloat16), w_om_ref[...],
                    preferred_element_type=jnp.float32)
    out_ref[...] = jnp.dot(h_out.astype(jnp.bfloat16), w_fin_ref[...],
                           preferred_element_type=jnp.float32)


def _simba_streaming_kernel(x_ref, mean_ref, invstd_ref, w_emb_ref,
                            w1_ref, w2_ref, alpha_ref, w_om_ref, w_fin_ref,
                            out_ref, h_ref):
    """Fallback path for very large models: w1/w2 streamed per block (double-buffered),
    hidden state carried across the block grid axis in VMEM scratch."""
    j = pl.program_id(1)
    last = pl.num_programs(1) - 1

    @pl.when(j == 0)
    def _embed():
        x = x_ref[...]
        x_tilde = _l2_norm((x - mean_ref[...]) * invstd_ref[...])
        h_ref[...] = _l2_norm(jnp.dot(x_tilde.astype(jnp.bfloat16), w_emb_ref[...],
                                      preferred_element_type=jnp.float32))

    h = h_ref[...]
    hm = jnp.dot(h.astype(jnp.bfloat16), w1_ref[...],
                 preferred_element_type=jnp.float32)
    hm = jnp.maximum(hm, 0.0)
    hm = jnp.dot(hm.astype(jnp.bfloat16), w2_ref[...],
                 preferred_element_type=jnp.float32)
    h_tilde = _l2_norm(hm)
    h_new = _l2_norm(h + alpha_ref[j] * (h_tilde - h))   # alpha resident, dyn-indexed
    h_ref[...] = h_new

    @pl.when(j == last)
    def _head():
        h_out = jnp.dot(h_new.astype(jnp.bfloat16), w_om_ref[...],
                        preferred_element_type=jnp.float32)
        out_ref[...] = jnp.dot(h_out.astype(jnp.bfloat16), w_fin_ref[...],
                               preferred_element_type=jnp.float32)


# --------------------------------------------------------------------------------------
# Parameters
# --------------------------------------------------------------------------------------

def orthogonal_init(key, in_dim, out_dim):
    """Orthogonal weight of shape (in_dim, out_dim) (deterministic given key)."""
    big, small = max(in_dim, out_dim), min(in_dim, out_dim)
    a = jax.random.normal(key, (big, small), jnp.float32)
    q, r = jnp.linalg.qr(a)
    q = q * jnp.sign(jnp.diagonal(r))[None, :]
    w = q if in_dim >= out_dim else q.T
    return w[:in_dim, :out_dim].astype(jnp.float32)


def init_simba_params(key, obs_shape, action_dim, hidden_dim, num_blocks):
    bottleneck = hidden_dim * 4
    keys = jax.random.split(key, 3 + 2 * num_blocks)
    p = {}
    # RSNorm running stats (as at __init__)
    p["rs_mean"] = jnp.zeros((obs_shape,), jnp.float32)
    p["rs_var"] = jnp.ones((obs_shape,), jnp.float32)
    # Embedding
    p["w_emb"] = orthogonal_init(keys[0], obs_shape + 1, hidden_dim)
    p["s_emb"] = jnp.full((1, hidden_dim), math.sqrt(2.0 / hidden_dim), jnp.float32)
    # Blocks (stacked along a leading axis)
    w1s, w2s = [], []
    for i in range(num_blocks):
        w1s.append(orthogonal_init(keys[1 + 2 * i], hidden_dim, bottleneck))
        w2s.append(orthogonal_init(keys[2 + 2 * i], bottleneck, hidden_dim))
    p["w1"] = jnp.stack(w1s)                                             # [nb, H, 4H]
    p["w2"] = jnp.stack(w2s)                                             # [nb, 4H, H]
    p["s1"] = jnp.full((num_blocks, 1, bottleneck),
                       math.sqrt(2.0 / bottleneck), jnp.float32)         # Scaler (effective init)
    p["alpha"] = jnp.full((num_blocks, 1, hidden_dim),
                          1.0 / (num_blocks + 1), jnp.float32)           # LERP (effective init)
    # Output MLP + final head
    p["w_om"] = orthogonal_init(keys[1 + 2 * num_blocks], hidden_dim, hidden_dim)
    p["s_om"] = jnp.full((1, hidden_dim), math.sqrt(2.0 / hidden_dim), jnp.float32)
    p["w_fin"] = orthogonal_init(keys[2 + 2 * num_blocks], hidden_dim, action_dim)
    return p


def prepare_simba_weights(params):
    """One-time weight preparation (cache the result and reuse across forward calls):
    fold per-column scalers into the weights in f32, cast to bf16 once, pad the head
    to a lane-dense 128-wide block, and build extended RSNorm stats for the shift col."""
    H = params["w_emb"].shape[1]
    A = params["w_fin"].shape[1]
    A_pad = _round_up(max(A, 128), 128)

    mean_ext = jnp.concatenate(
        [params["rs_mean"], jnp.zeros((1,), jnp.float32)])[None, :]
    invstd_ext = jnp.concatenate(
        [1.0 / jnp.sqrt(params["rs_var"] + RS_EPS),
         jnp.ones((1,), jnp.float32)])[None, :]

    w_emb = (params["w_emb"] * params["s_emb"]).astype(jnp.bfloat16)      # (O+1, H)
    w1 = (params["w1"] * params["s1"]).astype(jnp.bfloat16)               # (nb, H, 4H)
    w2 = params["w2"].astype(jnp.bfloat16)                                # (nb, 4H, H)
    alpha = params["alpha"].astype(jnp.float32)                           # (nb, 1, H)
    w_om = (params["w_om"] * params["s_om"]).astype(jnp.bfloat16)         # (H, H)
    w_fin = jnp.zeros((H, A_pad), jnp.float32).at[:, :A].set(
        params["w_fin"]).astype(jnp.bfloat16)                             # (H, A_pad)

    return dict(mean=mean_ext, invstd=invstd_ext, w_emb=w_emb, w1=w1, w2=w2,
                alpha=alpha, w_om=w_om, w_fin=w_fin, action_dim=A)


# --------------------------------------------------------------------------------------
# Forward
# --------------------------------------------------------------------------------------

def simba_v2_forward(x, prepared, *, shift_constant=3.0, batch_tile=256):
    x = x.astype(jnp.float32)
    if x.ndim == 1:
        x = x[None, :]
    B, O = x.shape
    OE = O + 1
    H = prepared["w_emb"].shape[1]
    nb, _, BN = prepared["w1"].shape
    A = prepared["action_dim"]
    A_pad = prepared["w_fin"].shape[1]

    vmem_cap = _vmem_capacity_bytes()

    # Total weight footprint if made VMEM-resident (the preferred path).
    weight_arrays = ("mean", "invstd", "w_emb", "w1", "w2", "alpha", "w_om", "w_fin")
    weight_bytes = sum(int(prepared[k].nbytes) for k in weight_arrays)

    # Candidate batch tile (multiple of 8 sublanes).
    B8 = _round_up(B, 8)
    TB = min(batch_tile, B8)

    # Per-tile activation VMEM estimate (x/out double-buffered blocks, ReLU intermediate,
    # a few (TB,H) f32 temporaries).
    def act_bytes(tb):
        return 2 * tb * OE * 4 + 2 * tb * A_pad * 4 + tb * BN * 4 + 4 * tb * H * 4

    resident = (weight_bytes + act_bytes(TB) + (2 << 20)) <= int(0.7 * vmem_cap)

    if resident and B8 >= 16 and B8 <= TB:
        # Split the batch into >= 2 tiles so the "parallel" axis can span both
        # TensorCores on v7x (harmless on single-TC v5e/v6e: weights are resident).
        TB = _round_up((B8 + 1) // 2, 8)
    B_pad = _round_up(B, TB)
    grid_b = B_pad // TB

    # Glue (plain JAX): append the shift column and pad the batch.
    x_ext = jnp.concatenate(
        [x, jnp.full((B, 1), shift_constant, jnp.float32)], axis=-1)
    if B_pad != B:
        x_ext = jnp.zeros((B_pad, OE), jnp.float32).at[:B].set(x_ext)

    # VMEM budget (honorable on v7x's 64 MiB as well as v5e/v6e's 128 MiB).
    if resident:
        needed = weight_bytes + act_bytes(TB) + (2 << 20)
    else:
        res_small = sum(int(prepared[k].nbytes)
                        for k in ("mean", "invstd", "w_emb", "alpha", "w_om", "w_fin"))
        needed = 2 * (H * BN + BN * H) * 2 + res_small + act_bytes(TB) + (2 << 20)
    vmem_limit = int(min(max(int(1.2 * needed), 32 << 20), int(0.85 * vmem_cap)))

    vmem = pltpu.MemorySpace.VMEM
    args = (x_ext, prepared["mean"], prepared["invstd"], prepared["w_emb"],
            prepared["w1"], prepared["w2"], prepared["alpha"],
            prepared["w_om"], prepared["w_fin"])

    if resident:
        in_specs = [
            pl.BlockSpec((TB, OE), lambda i: (i, 0)),          # x (per batch tile)
            pl.BlockSpec(memory_space=vmem),                   # mean
            pl.BlockSpec(memory_space=vmem),                   # invstd
            pl.BlockSpec(memory_space=vmem),                   # w_emb
            pl.BlockSpec(memory_space=vmem),                   # w1 (all blocks resident)
            pl.BlockSpec(memory_space=vmem),                   # w2
            pl.BlockSpec(memory_space=vmem),                   # alpha
            pl.BlockSpec(memory_space=vmem),                   # w_om
            pl.BlockSpec(memory_space=vmem),                   # w_fin
        ]
        out_pad = pl.pallas_call(
            _simba_resident_kernel,
            grid=(grid_b,),
            in_specs=in_specs,
            out_specs=pl.BlockSpec((TB, A_pad), lambda i: (i, 0)),
            out_shape=jax.ShapeDtypeStruct((B_pad, A_pad), jnp.float32),
            compiler_params=pltpu.CompilerParams(
                dimension_semantics=("parallel",),
                vmem_limit_bytes=vmem_limit),
        )(*args)
    else:
        in_specs = [
            pl.BlockSpec((TB, OE), lambda i, j: (i, 0)),          # x (per batch tile)
            pl.BlockSpec(memory_space=vmem),                      # mean
            pl.BlockSpec(memory_space=vmem),                      # invstd
            pl.BlockSpec(memory_space=vmem),                      # w_emb
            pl.BlockSpec((None, H, BN), lambda i, j: (j, 0, 0)),  # w1 streamed, squeezed
            pl.BlockSpec((None, BN, H), lambda i, j: (j, 0, 0)),  # w2 streamed, squeezed
            pl.BlockSpec(memory_space=vmem),                      # alpha (small, resident)
            pl.BlockSpec(memory_space=vmem),                      # w_om
            pl.BlockSpec(memory_space=vmem),                      # w_fin
        ]
        out_pad = pl.pallas_call(
            _simba_streaming_kernel,
            grid=(grid_b, nb),
            in_specs=in_specs,
            out_specs=pl.BlockSpec((TB, A_pad), lambda i, j: (i, 0)),
            out_shape=jax.ShapeDtypeStruct((B_pad, A_pad), jnp.float32),
            scratch_shapes=[pltpu.VMEM((TB, H), jnp.float32)],    # carried hidden state
            compiler_params=pltpu.CompilerParams(
                dimension_semantics=("parallel", "arbitrary"),
                vmem_limit_bytes=vmem_limit),
        )(*args)

    return out_pad[:B, :A]


def simba_v2_reference(x, prepared, *, shift_constant=3.0):
    """Pure-JAX reference matching the kernel's precision (folded bf16 weights, f32 accum)."""
    x = x.astype(jnp.float32)
    if x.ndim == 1:
        x = x[None, :]

    def bdot(a, w):
        return jnp.dot(a.astype(jnp.bfloat16), w, preferred_element_type=jnp.float32)

    A = prepared["action_dim"]
    x_ext = jnp.concatenate(
        [x, jnp.full((x.shape[0], 1), shift_constant, jnp.float32)], axis=-1)
    x_tilde = _l2_norm((x_ext - prepared["mean"]) * prepared["invstd"])
    h = _l2_norm(bdot(x_tilde, prepared["w_emb"]))
    for j in range(prepared["w1"].shape[0]):
        hm = jnp.maximum(bdot(h, prepared["w1"][j]), 0.0)
        hm = bdot(hm, prepared["w2"][j])
        ht = _l2_norm(hm)
        h = _l2_norm(h + prepared["alpha"][j] * (ht - h))
    h_out = bdot(h, prepared["w_om"])
    return bdot(h_out, prepared["w_fin"])[:, :A]


if __name__ == "__main__":
    # TODO(synk): RSNorm running-stat *updates* (training mode) and the critic-mode
    # output_final_scaler / return_features variants are not implemented; this is the
    # eval-mode actor forward pass.
    OBS, ACT, HID, NB, BATCH = 16, 8, 32, 4, 2

    key = jax.random.PRNGKey(0)
    k_x, k_p = jax.random.split(key)
    x = jax.random.normal(k_x, (BATCH, OBS), jnp.float32)
    params = init_simba_params(k_p, OBS, ACT, HID, NB)
    prepared = prepare_simba_weights(params)     # one-time fold + bf16 cast (cached)

    out = simba_v2_forward(x, prepared)
    out = jax.block_until_ready(out)

    ref = simba_v2_reference(x, prepared)
    assert out.shape == (BATCH, ACT)
    assert jnp.allclose(out, ref, rtol=2e-3, atol=2e-3), (out, ref)

    print("KERNEL_OK")
</pallas_src>

<mosaic_0001>
module attributes {stable_mosaic.version = 11 : i64} {
  func.func @_simba_resident_kernel(%arg0: i32, %arg1: memref<8x17xf32, #tpu.memory_space<vmem>>, %arg2: memref<1x17xf32, #tpu.memory_space<vmem>>, %arg3: memref<1x17xf32, #tpu.memory_space<vmem>>, %arg4: memref<17x32xbf16, #tpu.memory_space<vmem>>, %arg5: memref<4x32x128xbf16, #tpu.memory_space<vmem>>, %arg6: memref<4x128x32xbf16, #tpu.memory_space<vmem>>, %arg7: memref<4x1x32xf32, #tpu.memory_space<vmem>>, %arg8: memref<32x32xbf16, #tpu.memory_space<vmem>>, %arg9: memref<32x128xbf16, #tpu.memory_space<vmem>>, %arg10: memref<8x128xf32, #tpu.memory_space<vmem>>) attributes {dimension_semantics = [#tpu.dimension_semantics<parallel>], iteration_bounds = array<i64: 1>, scalar_prefetch = 0 : i64, scratch_operands = 0 : i64, tpu.core_type = #tpu.core_type<tc>, window_params = [{transform_indices = @transform_0, window_bounds = array<i64: 8, 17>}, {pipeline_mode = #tpu.pipeline_mode<synchronous>, transform_indices = @transform_1, window_bounds = array<i64: 1, 17>}, {pipeline_mode = #tpu.pipeline_mode<synchronous>, transform_indices = @transform_2, window_bounds = array<i64: 1, 17>}, {pipeline_mode = #tpu.pipeline_mode<synchronous>, transform_indices = @transform_3, window_bounds = array<i64: 17, 32>}, {pipeline_mode = #tpu.pipeline_mode<synchronous>, transform_indices = @transform_4, window_bounds = array<i64: 4, 32, 128>}, {pipeline_mode = #tpu.pipeline_mode<synchronous>, transform_indices = @transform_5, window_bounds = array<i64: 4, 128, 32>}, {pipeline_mode = #tpu.pipeline_mode<synchronous>, transform_indices = @transform_6, window_bounds = array<i64: 4, 1, 32>}, {pipeline_mode = #tpu.pipeline_mode<synchronous>, transform_indices = @transform_7, window_bounds = array<i64: 32, 32>}, {pipeline_mode = #tpu.pipeline_mode<synchronous>, transform_indices = @transform_8, window_bounds = array<i64: 32, 128>}, {transform_indices = @transform_9, window_bounds = array<i64: 8, 128>}]} {
    %c0 = arith.constant 0 : index
    %c0_0 = arith.constant 0 : index
    %0 = vector.load %arg1[%c0, %c0_0] : memref<8x17xf32, #tpu.memory_space<vmem>>, vector<8x17xf32>
    %c0_1 = arith.constant 0 : index
    %c0_2 = arith.constant 0 : index
    %1 = vector.load %arg2[%c0_1, %c0_2] : memref<1x17xf32, #tpu.memory_space<vmem>>, vector<1x17xf32>
    %2 = vector.broadcast %1 : vector<1x17xf32> to vector<8x17xf32>
    %3 = arith.subf %0, %2 : vector<8x17xf32>
    %c0_3 = arith.constant 0 : index
    %c0_4 = arith.constant 0 : index
    %4 = vector.load %arg3[%c0_3, %c0_4] : memref<1x17xf32, #tpu.memory_space<vmem>>, vector<1x17xf32>
    %5 = vector.broadcast %4 : vector<1x17xf32> to vector<8x17xf32>
    %6 = arith.mulf %3, %5 : vector<8x17xf32>
    %7 = arith.mulf %6, %6 : vector<8x17xf32>
    %cst = arith.constant dense<0.000000e+00> : vector<8xf32>
    %8 = vector.multi_reduction <add>, %7, %cst [1] : vector<8x17xf32> to vector<8xf32>
    %9 = vector.shape_cast %8 : vector<8xf32> to vector<8x1xf32>
    %cst_5 = arith.constant 9.99999993E-9 : f32
    %10 = vector.broadcast %cst_5 : f32 to vector<8x1xf32>
    %11 = arith.addf %9, %10 : vector<8x1xf32>
    %12 = math.rsqrt %11 : vector<8x1xf32>
    %13 = vector.broadcast %12 : vector<8x1xf32> to vector<8x17xf32>
    %14 = arith.mulf %6, %13 : vector<8x17xf32>
    %15 = arith.truncf %14 : vector<8x17xf32> to vector<8x17xbf16>
    %c0_6 = arith.constant 0 : index
    %c0_7 = arith.constant 0 : index
    %16 = vector.load %arg4[%c0_6, %c0_7] : memref<17x32xbf16, #tpu.memory_space<vmem>>, vector<17x32xbf16>
    %cst_8 = arith.constant dense<0.000000e+00> : vector<8x32xf32>
    %17 = tpu.matmul %15, %16, %cst_8 {dimension_numbers = #tpu.dot_dimension_numbers<[1], [0], [0], [1], [0, 0, 1, 1], [], []>} : vector<8x17xbf16>, vector<17x32xbf16>, vector<8x32xf32> -> vector<8x32xf32>
    %18 = arith.mulf %17, %17 : vector<8x32xf32>
    %cst_9 = arith.constant dense<0.000000e+00> : vector<8xf32>
    %19 = vector.multi_reduction <add>, %18, %cst_9 [1] : vector<8x32xf32> to vector<8xf32>
    %20 = vector.shape_cast %19 : vector<8xf32> to vector<8x1xf32>
    %cst_10 = arith.constant 9.99999993E-9 : f32
    %21 = vector.broadcast %cst_10 : f32 to vector<8x1xf32>
    %22 = arith.addf %20, %21 : vector<8x1xf32>
    %23 = math.rsqrt %22 : vector<8x1xf32>
    %24 = vector.broadcast %23 : vector<8x1xf32> to vector<8x32xf32>
    %25 = arith.mulf %17, %24 : vector<8x32xf32>
    %26 = arith.truncf %25 : vector<8x32xf32> to vector<8x32xbf16>
    %c0_11 = arith.constant 0 : index
    %c0_12 = arith.constant 0 : index
    %c0_13 = arith.constant 0 : index
    %27 = vector.load %arg5[%c0_11, %c0_12, %c0_13] : memref<4x32x128xbf16, #tpu.memory_space<vmem>>, vector<1x32x128xbf16>
    %28 = vector.shape_cast %27 : vector<1x32x128xbf16> to vector<32x128xbf16>
    %cst_14 = arith.constant dense<0.000000e+00> : vector<8x128xf32>
    %29 = tpu.matmul %26, %28, %cst_14 {dimension_numbers = #tpu.dot_dimension_numbers<[1], [0], [0], [1], [0, 0, 1, 1], [], []>} : vector<8x32xbf16>, vector<32x128xbf16>, vector<8x128xf32> -> vector<8x128xf32>
    %cst_15 = arith.constant 0.000000e+00 : f32
    %30 = vector.broadcast %cst_15 : f32 to vector<8x128xf32>
    %31 = arith.maximumf %29, %30 : vector<8x128xf32>
    %32 = arith.truncf %31 : vector<8x128xf32> to vector<8x128xbf16>
    %c0_16 = arith.constant 0 : index
    %c0_17 = arith.constant 0 : index
    %c0_18 = arith.constant 0 : index
    %33 = vector.load %arg6[%c0_16, %c0_17, %c0_18] : memref<4x128x32xbf16, #tpu.memory_space<vmem>>, vector<1x128x32xbf16>
    %34 = vector.shape_cast %33 : vector<1x128x32xbf16> to vector<128x32xbf16>
    %cst_19 = arith.constant dense<0.000000e+00> : vector<8x32xf32>
    %35 = tpu.matmul %32, %34, %cst_19 {dimension_numbers = #tpu.dot_dimension_numbers<[1], [0], [0], [1], [0, 0, 1, 1], [], []>} : vector<8x128xbf16>, vector<128x32xbf16>, vector<8x32xf32> -> vector<8x32xf32>
    %36 = arith.mulf %35, %35 : vector<8x32xf32>
    %cst_20 = arith.constant dense<0.000000e+00> : vector<8xf32>
    %37 = vector.multi_reduction <add>, %36, %cst_20 [1] : vector<8x32xf32> to vector<8xf32>
    %38 = vector.shape_cast %37 : vector<8xf32> to vector<8x1xf32>
    %cst_21 = arith.constant 9.99999993E-9 : f32
    %39 = vector.broadcast %cst_21 : f32 to vector<8x1xf32>
    %40 = arith.addf %38, %39 : vector<8x1xf32>
    %41 = math.rsqrt %40 : vector<8x1xf32>
    %42 = vector.broadcast %41 : vector<8x1xf32> to vector<8x32xf32>
    %43 = arith.mulf %35, %42 : vector<8x32xf32>
    %c0_22 = arith.constant 0 : index
    %c0_23 = arith.constant 0 : index
    %c0_24 = arith.constant 0 : index
    %44 = vector.load %arg7[%c0_22, %c0_23, %c0_24] : memref<4x1x32xf32, #tpu.memory_space<vmem>>, vector<1x1x32xf32>
    %45 = vector.shape_cast %44 : vector<1x1x32xf32> to vector<1x32xf32>
    %46 = arith.subf %43, %25 : vector<8x32xf32>
    %47 = vector.broadcast %45 : vector<1x32xf32> to vector<8x32xf32>
    %48 = arith.mulf %47, %46 : vector<8x32xf32>
    %49 = arith.addf %25, %48 : vector<8x32xf32>
    %50 = arith.mulf %49, %49 : vector<8x32xf32>
    %cst_25 = arith.constant dense<0.000000e+00> : vector<8xf32>
    %51 = vector.multi_reduction <add>, %50, %cst_25 [1] : vector<8x32xf32> to vector<8xf32>
    %52 = vector.shape_cast %51 : vector<8xf32> to vector<8x1xf32>
    %cst_26 = arith.constant 9.99999993E-9 : f32
    %53 = vector.broadcast %cst_26 : f32 to vector<8x1xf32>
    %54 = arith.addf %52, %53 : vector<8x1xf32>
    %55 = math.rsqrt %54 : vector<8x1xf32>
    %56 = vector.broadcast %55 : vector<8x1xf32> to vector<8x32xf32>
    %57 = arith.mulf %49, %56 : vector<8x32xf32>
    %58 = arith.truncf %57 : vector<8x32xf32> to vector<8x32xbf16>
    %c1 = arith.constant 1 : index
    %c0_27 = arith.constant 0 : index
    %c0_28 = arith.constant 0 : index
    %59 = vector.load %arg5[%c1, %c0_27, %c0_28] : memref<4x32x128xbf16, #tpu.memory_space<vmem>>, vector<1x32x128xbf16>
    %60 = vector.shape_cast %59 : vector<1x32x128xbf16> to vector<32x128xbf16>
    %cst_29 = arith.constant dense<0.000000e+00> : vector<8x128xf32>
    %61 = tpu.matmul %58, %60, %cst_29 {dimension_numbers = #tpu.dot_dimension_numbers<[1], [0], [0], [1], [0, 0, 1, 1], [], []>} : vector<8x32xbf16>, vector<32x128xbf16>, vector<8x128xf32> -> vector<8x128xf32>
    %cst_30 = arith.constant 0.000000e+00 : f32
    %62 = vector.broadcast %cst_30 : f32 to vector<8x128xf32>
    %63 = arith.maximumf %61, %62 : vector<8x128xf32>
    %64 = arith.truncf %63 : vector<8x128xf32> to vector<8x128xbf16>
    %c1_31 = arith.constant 1 : index
    %c0_32 = arith.constant 0 : index
    %c0_33 = arith.constant 0 : index
    %65 = vector.load %arg6[%c1_31, %c0_32, %c0_33] : memref<4x128x32xbf16, #tpu.memory_space<vmem>>, vector<1x128x32xbf16>
    %66 = vector.shape_cast %65 : vector<1x128x32xbf16> to vector<128x32xbf16>
    %cst_34 = arith.constant dense<0.000000e+00> : vector<8x32xf32>
    %67 = tpu.matmul %64, %66, %cst_34 {dimension_numbers = #tpu.dot_dimension_numbers<[1], [0], [0], [1], [0, 0, 1, 1], [], []>} : vector<8x128xbf16>, vector<128x32xbf16>, vector<8x32xf32> -> vector<8x32xf32>
    %68 = arith.mulf %67, %67 : vector<8x32xf32>
    %cst_35 = arith.constant dense<0.000000e+00> : vector<8xf32>
    %69 = vector.multi_reduction <add>, %68, %cst_35 [1] : vector<8x32xf32> to vector<8xf32>
    %70 = vector.shape_cast %69 : vector<8xf32> to vector<8x1xf32>
    %cst_36 = arith.constant 9.99999993E-9 : f32
    %71 = vector.broadcast %cst_36 : f32 to vector<8x1xf32>
    %72 = arith.addf %70, %71 : vector<8x1xf32>
    %73 = math.rsqrt %72 : vector<8x1xf32>
    %74 = vector.broadcast %73 : vector<8x1xf32> to vector<8x32xf32>
    %75 = arith.mulf %67, %74 : vector<8x32xf32>
    %c1_37 = arith.constant 1 : index
    %c0_38 = arith.constant 0 : index
    %c0_39 = arith.constant 0 : index
    %76 = vector.load %arg7[%c1_37, %c0_38, %c0_39] : memref<4x1x32xf32, #tpu.memory_space<vmem>>, vector<1x1x32xf32>
    %77 = vector.shape_cast %76 : vector<1x1x32xf32> to vector<1x32xf32>
    %78 = arith.subf %75, %57 : vector<8x32xf32>
    %79 = vector.broadcast %77 : vector<1x32xf32> to vector<8x32xf32>
    %80 = arith.mulf %79, %78 : vector<8x32xf32>
    %81 = arith.addf %57, %80 : vector<8x32xf32>
    %82 = arith.mulf %81, %81 : vector<8x32xf32>
    %cst_40 = arith.constant dense<0.000000e+00> : vector<8xf32>
    %83 = vector.multi_reduction <add>, %82, %cst_40 [1] : vector<8x32xf32> to vector<8xf32>
    %84 = vector.shape_cast %83 : vector<8xf32> to vector<8x1xf32>
    %cst_41 = arith.constant 9.99999993E-9 : f32
    %85 = vector.broadcast %cst_41 : f32 to vector<8x1xf32>
    %86 = arith.addf %84, %85 : vector<8x1xf32>
    %87 = math.rsqrt %86 : vector<8x1xf32>
    %88 = vector.broadcast %87 : vector<8x1xf32> to vector<8x32xf32>
    %89 = arith.mulf %81, %88 : vector<8x32xf32>
    %90 = arith.truncf %89 : vector<8x32xf32> to vector<8x32xbf16>
    %c2 = arith.constant 2 : index
    %c0_42 = arith.constant 0 : index
    %c0_43 = arith.constant 0 : index
    %91 = vector.load %arg5[%c2, %c0_42, %c0_43] : memref<4x32x128xbf16, #tpu.memory_space<vmem>>, vector<1x32x128xbf16>
    %92 = vector.shape_cast %91 : vector<1x32x128xbf16> to vector<32x128xbf16>
    %cst_44 = arith.constant dense<0.000000e+00> : vector<8x128xf32>
    %93 = tpu.matmul %90, %92, %cst_44 {dimension_numbers = #tpu.dot_dimension_numbers<[1], [0], [0], [1], [0, 0, 1, 1], [], []>} : vector<8x32xbf16>, vector<32x128xbf16>, vector<8x128xf32> -> vector<8x128xf32>
    %cst_45 = arith.constant 0.000000e+00 : f32
    %94 = vector.broadcast %cst_45 : f32 to vector<8x128xf32>
    %95 = arith.maximumf %93, %94 : vector<8x128xf32>
    %96 = arith.truncf %95 : vector<8x128xf32> to vector<8x128xbf16>
    %c2_46 = arith.constant 2 : index
    %c0_47 = arith.constant 0 : index
    %c0_48 = arith.constant 0 : index
    %97 = vector.load %arg6[%c2_46, %c0_47, %c0_48] : memref<4x128x32xbf16, #tpu.memory_space<vmem>>, vector<1x128x32xbf16>
    %98 = vector.shape_cast %97 : vector<1x128x32xbf16> to vector<128x32xbf16>
    %cst_49 = arith.constant dense<0.000000e+00> : vector<8x32xf32>
    %99 = tpu.matmul %96, %98, %cst_49 {dimension_numbers = #tpu.dot_dimension_numbers<[1], [0], [0], [1], [0, 0, 1, 1], [], []>} : vector<8x128xbf16>, vector<128x32xbf16>, vector<8x32xf32> -> vector<8x32xf32>
    %100 = arith.mulf %99, %99 : vector<8x32xf32>
    %cst_50 = arith.constant dense<0.000000e+00> : vector<8xf32>
    %101 = vector.multi_reduction <add>, %100, %cst_50 [1] : vector<8x32xf32> to vector<8xf32>
    %102 = vector.shape_cast %101 : vector<8xf32> to vector<8x1xf32>
    %cst_51 = arith.constant 9.99999993E-9 : f32
    %103 = vector.broadcast %cst_51 : f32 to vector<8x1xf32>
    %104 = arith.addf %102, %103 : vector<8x1xf32>
    %105 = math.rsqrt %104 : vector<8x1xf32>
    %106 = vector.broadcast %105 : vector<8x1xf32> to vector<8x32xf32>
    %107 = arith.mulf %99, %106 : vector<8x32xf32>
    %c2_52 = arith.constant 2 : index
    %c0_53 = arith.constant 0 : index
    %c0_54 = arith.constant 0 : index
    %108 = vector.load %arg7[%c2_52, %c0_53, %c0_54] : memref<4x1x32xf32, #tpu.memory_space<vmem>>, vector<1x1x32xf32>
    %109 = vector.shape_cast %108 : vector<1x1x32xf32> to vector<1x32xf32>
    %110 = arith.subf %107, %89 : vector<8x32xf32>
    %111 = vector.broadcast %109 : vector<1x32xf32> to vector<8x32xf32>
    %112 = arith.mulf %111, %110 : vector<8x32xf32>
    %113 = arith.addf %89, %112 : vector<8x32xf32>
    %114 = arith.mulf %113, %113 : vector<8x32xf32>
    %cst_55 = arith.constant dense<0.000000e+00> : vector<8xf32>
    %115 = vector.multi_reduction <add>, %114, %cst_55 [1] : vector<8x32xf32> to vector<8xf32>
    %116 = vector.shape_cast %115 : vector<8xf32> to vector<8x1xf32>
    %cst_56 = arith.constant 9.99999993E-9 : f32
    %117 = vector.broadcast %cst_56 : f32 to vector<8x1xf32>
    %118 = arith.addf %116, %117 : vector<8x1xf32>
    %119 = math.rsqrt %118 : vector<8x1xf32>
    %120 = vector.broadcast %119 : vector<8x1xf32> to vector<8x32xf32>
    %121 = arith.mulf %113, %120 : vector<8x32xf32>
    %122 = arith.truncf %121 : vector<8x32xf32> to vector<8x32xbf16>
    %c3 = arith.constant 3 : index
    %c0_57 = arith.constant 0 : index
    %c0_58 = arith.constant 0 : index
    %123 = vector.load %arg5[%c3, %c0_57, %c0_58] : memref<4x32x128xbf16, #tpu.memory_space<vmem>>, vector<1x32x128xbf16>
    %124 = vector.shape_cast %123 : vector<1x32x128xbf16> to vector<32x128xbf16>
    %cst_59 = arith.constant dense<0.000000e+00> : vector<8x128xf32>
    %125 = tpu.matmul %122, %124, %cst_59 {dimension_numbers = #tpu.dot_dimension_numbers<[1], [0], [0], [1], [0, 0, 1, 1], [], []>} : vector<8x32xbf16>, vector<32x128xbf16>, vector<8x128xf32> -> vector<8x128xf32>
    %cst_60 = arith.constant 0.000000e+00 : f32
    %126 = vector.broadcast %cst_60 : f32 to vector<8x128xf32>
    %127 = arith.maximumf %125, %126 : vector<8x128xf32>
    %128 = arith.truncf %127 : vector<8x128xf32> to vector<8x128xbf16>
    %c3_61 = arith.constant 3 : index
    %c0_62 = arith.constant 0 : index
    %c0_63 = arith.constant 0 : index
    %129 = vector.load %arg6[%c3_61, %c0_62, %c0_63] : memref<4x128x32xbf16, #tpu.memory_space<vmem>>, vector<1x128x32xbf16>
    %130 = vector.shape_cast %129 : vector<1x128x32xbf16> to vector<128x32xbf16>
    %cst_64 = arith.constant dense<0.000000e+00> : vector<8x32xf32>
    %131 = tpu.matmul %128, %130, %cst_64 {dimension_numbers = #tpu.dot_dimension_numbers<[1], [0], [0], [1], [0, 0, 1, 1], [], []>} : vector<8x128xbf16>, vector<128x32xbf16>, vector<8x32xf32> -> vector<8x32xf32>
    %132 = arith.mulf %131, %131 : vector<8x32xf32>
    %cst_65 = arith.constant dense<0.000000e+00> : vector<8xf32>
    %133 = vector.multi_reduction <add>, %132, %cst_65 [1] : vector<8x32xf32> to vector<8xf32>
    %134 = vector.shape_cast %133 : vector<8xf32> to vector<8x1xf32>
    %cst_66 = arith.constant 9.99999993E-9 : f32
    %135 = vector.broadcast %cst_66 : f32 to vector<8x1xf32>
    %136 = arith.addf %134, %135 : vector<8x1xf32>
    %137 = math.rsqrt %136 : vector<8x1xf32>
    %138 = vector.broadcast %137 : vector<8x1xf32> to vector<8x32xf32>
    %139 = arith.mulf %131, %138 : vector<8x32xf32>
    %c3_67 = arith.constant 3 : index
    %c0_68 = arith.constant 0 : index
    %c0_69 = arith.constant 0 : index
    %140 = vector.load %arg7[%c3_67, %c0_68, %c0_69] : memref<4x1x32xf32, #tpu.memory_space<vmem>>, vector<1x1x32xf32>
    %141 = vector.shape_cast %140 : vector<1x1x32xf32> to vector<1x32xf32>
    %142 = arith.subf %139, %121 : vector<8x32xf32>
    %143 = vector.broadcast %141 : vector<1x32xf32> to vector<8x32xf32>
    %144 = arith.mulf %143, %142 : vector<8x32xf32>
    %145 = arith.addf %121, %144 : vector<8x32xf32>
    %146 = arith.mulf %145, %145 : vector<8x32xf32>
    %cst_70 = arith.constant dense<0.000000e+00> : vector<8xf32>
    %147 = vector.multi_reduction <add>, %146, %cst_70 [1] : vector<8x32xf32> to vector<8xf32>
    %148 = vector.shape_cast %147 : vector<8xf32> to vector<8x1xf32>
    %cst_71 = arith.constant 9.99999993E-9 : f32
    %149 = vector.broadcast %cst_71 : f32 to vector<8x1xf32>
    %150 = arith.addf %148, %149 : vector<8x1xf32>
    %151 = math.rsqrt %150 : vector<8x1xf32>
    %152 = vector.broadcast %151 : vector<8x1xf32> to vector<8x32xf32>
    %153 = arith.mulf %145, %152 : vector<8x32xf32>
    %154 = arith.truncf %153 : vector<8x32xf32> to vector<8x32xbf16>
    %c0_72 = arith.constant 0 : index
    %c0_73 = arith.constant 0 : index
    %155 = vector.load %arg8[%c0_72, %c0_73] : memref<32x32xbf16, #tpu.memory_space<vmem>>, vector<32x32xbf16>
    %cst_74 = arith.constant dense<0.000000e+00> : vector<8x32xf32>
    %156 = tpu.matmul %154, %155, %cst_74 {dimension_numbers = #tpu.dot_dimension_numbers<[1], [0], [0], [1], [0, 0, 1, 1], [], []>} : vector<8x32xbf16>, vector<32x32xbf16>, vector<8x32xf32> -> vector<8x32xf32>
    %157 = arith.truncf %156 : vector<8x32xf32> to vector<8x32xbf16>
    %c0_75 = arith.constant 0 : index
    %c0_76 = arith.constant 0 : index
    %158 = vector.load %arg9[%c0_75, %c0_76] : memref<32x128xbf16, #tpu.memory_space<vmem>>, vector<32x128xbf16>
    %cst_77 = arith.constant dense<0.000000e+00> : vector<8x128xf32>
    %159 = tpu.matmul %157, %158, %cst_77 {dimension_numbers = #tpu.dot_dimension_numbers<[1], [0], [0], [1], [0, 0, 1, 1], [], []>} : vector<8x32xbf16>, vector<32x128xbf16>, vector<8x128xf32> -> vector<8x128xf32>
    %c0_78 = arith.constant 0 : index
    %c0_79 = arith.constant 0 : index
    %160 = vector.load %arg10[%c0_78, %c0_79] : memref<8x128xf32, #tpu.memory_space<vmem>>, vector<8x128xf32>
    tpu.vector_store %arg10[%c0_78, %c0_79], %159 {strides = array<i32>} : memref<8x128xf32, #tpu.memory_space<vmem>>, vector<8x128xf32>,
    return
  }
  func.func @transform_0(%arg0: i32) -> (i32, i32) {
    %c0_i32 = arith.constant 0 : i32
    %c0_i32_0 = arith.constant 0 : i32
    return %arg0, %c0_i32 : i32, i32
  }
  func.func @transform_1(%arg0: i32) -> (i32, i32) {
    %c0_i32 = arith.constant 0 : i32
    %c0_i32_0 = arith.constant 0 : i32
    %c0_i32_1 = arith.constant 0 : i32
    return %c0_i32, %c0_i32_0 : i32, i32
  }
  func.func @transform_2(%arg0: i32) -> (i32, i32) {
    %c0_i32 = arith.constant 0 : i32
    %c0_i32_0 = arith.constant 0 : i32
    %c0_i32_1 = arith.constant 0 : i32
    return %c0_i32, %c0_i32_0 : i32, i32
  }
  func.func @transform_3(%arg0: i32) -> (i32, i32) {
    %c0_i32 = arith.constant 0 : i32
    %c0_i32_0 = arith.constant 0 : i32
    %c0_i32_1 = arith.constant 0 : i32
    return %c0_i32, %c0_i32_0 : i32, i32
  }
  func.func @transform_4(%arg0: i32) -> (i32, i32, i32) {
    %c0_i32 = arith.constant 0 : i32
    %c0_i32_0 = arith.constant 0 : i32
    %c0_i32_1 = arith.constant 0 : i32
    %c0_i32_2 = arith.constant 0 : i32
    return %c0_i32, %c0_i32_0, %c0_i32_1 : i32, i32, i32
  }
  func.func @transform_5(%arg0: i32) -> (i32, i32, i32) {
    %c0_i32 = arith.constant 0 : i32
    %c0_i32_0 = arith.constant 0 : i32
    %c0_i32_1 = arith.constant 0 : i32
    %c0_i32_2 = arith.constant 0 : i32
    return %c0_i32, %c0_i32_0, %c0_i32_1 : i32, i32, i32
  }
  func.func @transform_6(%arg0: i32) -> (i32, i32, i32) {
    %c0_i32 = arith.constant 0 : i32
    %c0_i32_0 = arith.constant 0 : i32
    %c0_i32_1 = arith.constant 0 : i32
    %c0_i32_2 = arith.constant 0 : i32
    return %c0_i32, %c0_i32_0, %c0_i32_1 : i32, i32, i32
  }
  func.func @transform_7(%arg0: i32) -> (i32, i32) {
    %c0_i32 = arith.constant 0 : i32
    %c0_i32_0 = arith.constant 0 : i32
    %c0_i32_1 = arith.constant 0 : i32
    return %c0_i32, %c0_i32_0 : i32, i32
  }
  func.func @transform_8(%arg0: i32) -> (i32, i32) {
    %c0_i32 = arith.constant 0 : i32
    %c0_i32_0 = arith.constant 0 : i32
    %c0_i32_1 = arith.constant 0 : i32
    return %c0_i32, %c0_i32_0 : i32, i32
  }
  func.func @transform_9(%arg0: i32) -> (i32, i32) {
    %c0_i32 = arith.constant 0 : i32
    %c0_i32_0 = arith.constant 0 : i32
    return %arg0, %c0_i32 : i32, i32
  }
}

</mosaic_0001>

<bundles_post_ra>
// kernel: tpu_custom_call.1
= control target key start
LH: loop header
LB: loop body
LE: loop exit
PB: predicated region body
PF: predicated region fallthrough
CT: control target
= control target key end

     0   :  { %vm52_vm0 = vcmask 138240   ;;  %vm75_vm1 = vcmask 1040384   ;;  %v1442_v9 = vmov 0.0   ;;  %v1443_v10 = vmov 0   ;;  %s1752_s0 = inlined_call_operand.vmem [shape: f32[8,17], index: 0, kind: input, shape index: {}]   ;;  %s1753_s1 = inlined_call_operand.vmem [shape: f32[1,17], index: 1, kind: input, shape index: {}]   ;;  %s1754_s2 = inlined_call_operand.vmem [shape: f32[1,17], index: 2, kind: input, shape index: {}]   ;;  %s1755_s3 = inlined_call_operand.vmem [shape: bf16[17,32], index: 3, kind: input, shape index: {}]   ;;  %s1756_s4 = inlined_call_operand.vmem [shape: bf16[4,32,128], index: 4, kind: input, shape index: {}]   ;;  %s1757_s5 = inlined_call_operand.vmem [shape: bf16[4,128,32], index: 5, kind: input, shape index: {}]   ;;  %s1758_s6 = inlined_call_operand.vmem [shape: f32[4,1,32], index: 6, kind: input, shape index: {}]   ;;  %s1759_s7 = inlined_call_operand.vmem [shape: bf16[32,32], index: 7, kind: input, shape index: {}]   ;;  %s1760_s8 = inlined_call_operand.vmem [shape: bf16[32,128], index: 8, kind: input, shape index: {}]   ;;  %s1761_s9 = inlined_call_operand.hbm [shape: f32[8,128], index: 9, kind: output, shape index: {}]  }
   0x1   :  { %v34_v0 = vld [vmem:[%s1752_s0] sm:$0xff]  ;;  %v1353_v8 = vld [vmem:[%s1755_s3 + $0x8] ss:$0 sps:$4 sm:$0x11]   ;;  %1212 = vmatprep.subr.bf16.mxu0 %v1442_v9  ;;  %1220 = vmatprep.subr.bf16.mxu1 %v1442_v9  ;;  %v77_v11 = vsel %vm75_vm1, 65535, %v1443_v10  ;;  %vm1444_vm2 = vmmov 0  }
   0x2   :  { %v1033_v1 = vld [vmem:[%s1753_s1] ss:$0 sm:$0xff]  ;;  %1216 = vmatprep.mubr.msk.bf16.mxu0 %vm1444_vm2, %v1442_v9  ;;  %v79_v12 = vand.u32 %v1353_v8, %v77_v11  ;;  %1224 = vmatprep.mubr.msk.bf16.mxu1 %vm1444_vm2, %v1442_v9 }
   0x3   :  { %v1034_v2 = vld [vmem:[%s1754_s2] ss:$0 sm:$0xff]  ;;  %v42_v3 = vsub.f32 %v34_v0, %v1033_v1 }
   0x4   :  { %v1352_v7 = vld [vmem:[%s1755_s3] sm:$0xff]  }
   0x5   :  { %v50_v4 = vmul.f32 %v1034_v2, %v42_v3  ;;  %1213 = vmatpush3.bf16.msra.mxu0 %v1352_v7 }
   0x6   :  { %1214 = vmatprep.subr.bf16.mxu0 %v1442_v9 }
   0x7   :  { %v51_v5 = vmul.f32 %v50_v4, %v50_v4 }
   0x9   :  { %v53_v6 = vsel %vm52_vm0, %v51_v5, 0.0  ;;  %1215 = vmatpush3.bf16.msra.mxu0 %v79_v12 }
   0xa   :  { %54 = vadd.xlane.f32.xlu0 %v53_v6  ;;  %1228 = vmatprep.subr.bf16.mxu0 %v1442_v9 }
   0xb   :  { %14 = vsyncpa [#allocation3], 0  ;;  %vm122_vm3 = vcmask 261120   ;;  %v1354_v24 = vld [vmem:[%s1756_s4] sm:$0xff]   ;;  %v1355_v25 = vld [vmem:[%s1756_s4 + $0x8] sm:$0xff]  }
   0xc   :  { %1221 = vmatpush3.bf16.msra.mxu1 %v1354_v24  ;;  %v1356_v26 = vld [vmem:[%s1757_s5] sm:$0xff]   ;;  %v1357_v27 = vld [vmem:[%s1757_s5 + $0x8] sm:$0xff]   ;;  %v1358_v28 = vld [vmem:[%s1757_s5 + $0x10] sm:$0xff]  }
   0xd   :  { %1222 = vmatprep.subr.bf16.mxu1 %v1442_v9  ;;  %v1359_v29 = vld [vmem:[%s1757_s5 + $0x18] sm:$0xff]   ;;  %v1360_v30 = vld [vmem:[%s1757_s5 + $0x20] sm:$0xff]   ;;  %v1361_v31 = vld [vmem:[%s1757_s5 + $0x28] sm:$0xff]  }
   0xe   :  { %v1362_v32 = vld [vmem:[%s1757_s5 + $0x30] sm:$0xff]   ;;  %v1363_v38 = vld [vmem:[%s1757_s5 + $0x38] sm:$0xff]   ;;  %v1049_v55 = vld [vmem:[%s1758_s6] ss:$0 sm:$0xff] }
   0xf   :  { %v1364_v61 = vld [vmem:[%s1756_s4 + $0x10] sm:$0xff]   ;;  %v1365_v62 = vld [vmem:[%s1756_s4 + $0x18] sm:$0xff]   ;;  %v1366_v3 = vld [vmem:[%s1757_s5 + $0x40] sm:$0xff]  }
  0x10   :  { %1223 = vmatpush3.bf16.msra.mxu1 %v1355_v25  ;;  %v1367_v5 = vld [vmem:[%s1757_s5 + $0x48] sm:$0xff]   ;;  %v1368_v6 = vld [vmem:[%s1757_s5 + $0x50] sm:$0xff]   ;;  %v1369_v7 = vld [vmem:[%s1757_s5 + $0x58] sm:$0xff]  }
  0x11   :  { %1248 = vmatprep.subr.bf16.mxu1 %v1442_v9  ;;  %v1370_v8 = vld [vmem:[%s1757_s5 + $0x60] sm:$0xff]   ;;  %v1371_v10 = vld [vmem:[%s1757_s5 + $0x68] sm:$0xff]   ;;  %v1372_v11 = vld [vmem:[%s1757_s5 + $0x70] sm:$0xff]  }
  0x12   :  { %v1373_v12 = vld [vmem:[%s1757_s5 + $0x78] sm:$0xff]  }
  0x97   :  { %v55_v13 = vpop.xlane.xlu0 %54 }
  0x98   :  { %v56_v14 = vadd.f32 1e-08, %v55_v13 }
  0x9a   :  { %1398 = vrsqrt.f32 %v56_v14 }
  0xa4   :  { %v1399_v15 = vpop.eup %1398 }
  0xa5   :  { %v58_v16 = vmul.f32 %v1399_v15, %v50_v4 }
  0xa7   :  { %v59_v17 = vpack.c.bf16 %v58_v16, %v58_v16 }
  0xa9   :  { %1217 = vmatmul.mubr.msk.bf16.vlgmr.msra.gmra.mrb[0].mxu0 %vm52_vm0, %v59_v17 }
  0xaa   :  { %1244 = vmatprep.mubr.msk.bf16.mxu0 %vm1444_vm2, %v1442_v9  ;;  %1229 = vmatpush3.bf16.msra.mxu0 %v1356_v26 }
  0xab   :  { %1230 = vmatprep.subr.bf16.mxu0 %v1442_v9 }
  0xae   :  { %1231 = vmatpush3.bf16.msra.mxu0 %v1357_v27 }
  0xaf   :  { %1232 = vmatprep.subr.bf16.mxu0 %v1442_v9 }
  0xb2   :  { %1233 = vmatpush3.bf16.msra.mxu0 %v1358_v28 }
  0xb3   :  { %1234 = vmatprep.subr.bf16.mxu0 %v1442_v9 }
  0xb6   :  { %1235 = vmatpush3.bf16.msra.mxu0 %v1359_v29  ;;  %v1082_v29 = vld [vmem:[%s1758_s6 + $0x1] ss:$0 sm:$0xff] }
  0xb7   :  { %1236 = vmatprep.subr.bf16.mxu0 %v1442_v9 }
  0xba   :  { %1237 = vmatpush3.bf16.msra.mxu0 %v1360_v30 }
  0xbb   :  { %1238 = vmatprep.subr.bf16.mxu0 %v1442_v9 }
  0xbe   :  { %1239 = vmatpush3.bf16.msra.mxu0 %v1361_v31 }
  0xbf   :  { %1240 = vmatprep.subr.bf16.mxu0 %v1442_v9 }
  0xc2   :  { %1241 = vmatpush3.bf16.msra.mxu0 %v1362_v32 }
  0xc3   :  { %1242 = vmatprep.subr.bf16.mxu0 %v1442_v9 }
  0xc6   :  { %1243 = vmatpush3.bf16.msra.mxu0 %v1363_v38 }
  0xc7   :  { %1276 = vmatprep.subr.bf16.mxu0 %v1442_v9 }
 0x17c   :  { %v115_v18 = vpop.f32.mrb[0].mxu0 }
 0x17d   :  { %v121_v19 = vmul.f32 %v115_v18, %v115_v18  ;;  %v1218_v20 = vpop.f32.mrb[1].mxu0 }
 0x17e   :  { %v118_v21 = vpop.f32.mrb[2].mxu0 }
 0x17f   :  { %v1219_v22 = vpop.f32.mrb[3].mxu0  ;;  %v123_v23 = vsel %vm122_vm3, %v121_v19, 0.0 }
 0x180   :  { %124 = vadd.xlane.f32.xlu0 %v123_v23 }
 0x20d   :  { %v125_v33 = vpop.xlane.xlu0 %124 }
 0x20e   :  { %v126_v34 = vadd.f32 1e-08, %v125_v33 }
 0x210   :  { %1400 = vrsqrt.f32 %v126_v34 }
 0x21a   :  { %v1401_v35 = vpop.eup %1400 }
 0x21b   :  { %v128_v36 = vmul.f32 %v1401_v35, %v115_v18  ;;  %v1374_v35 = vld [vmem:[%s1756_s4 + $0x20] sm:$0xff]  }
 0x21d   :  { %v129_v37 = vpack.c.bf16 %v128_v36, %v128_v36 }
 0x21f   :  { %1225 = vmatmul.mubr.msk.bf16.vlgmr.msra.gmra.mrb[0].mxu1 %vm122_vm3, %v129_v37 }
 0x220   :  { %1252 = vmatprep.mubr.msk.bf16.mxu1 %vm1444_vm2, %v1442_v9  ;;  %1249 = vmatpush3.bf16.msra.mxu1 %v1364_v61 }
 0x221   :  { %1250 = vmatprep.subr.bf16.mxu1 %v1442_v9 }
 0x224   :  { %1251 = vmatpush3.bf16.msra.mxu1 %v1365_v62 }
 0x225   :  { %1256 = vmatprep.subr.bf16.mxu1 %v1442_v9 }
 0x2f2   :  { %v183_v39 = vpop.f32.mrb[0].mxu1 }
 0x2f3   :  { %v189_v40 = vmax.f32 %v183_v39, 0.0  ;;  %v1226_v41 = vpop.f32.mrb[1].mxu1 }
 0x2f4   :  { %v186_v42 = vpop.f32.mrb[2].mxu1  ;;  %v1376_v41 = vld [vmem:[%s1757_s5 + $0x80] sm:$0xff]  }
 0x2f5   :  { %v190_v43 = vpack.c.bf16 %v189_v40, %v189_v40  ;;  %v1227_v44 = vpop.f32.mrb[3].mxu1 }
 0x2f6   :  { %v1378_v44 = vld [vmem:[%s1757_s5 + $0x90] sm:$0xff]  }
 0x2f7   :  { %1245 = vmatmul.mubr.bf16.vlgmr.msra.gmra.mrb[4].mxu0 %v190_v43  ;;  %v1377_v43 = vld [vmem:[%s1757_s5 + $0x88] sm:$0xff]  }
 0x2f8   :  { %1280 = vmatprep.mubr.msk.bf16.mxu0 %vm1444_vm2, %v1442_v9  ;;  %1277 = vmatpush3.bf16.msra.mxu0 %v1374_v35 }
 0x2f9   :  { %1278 = vmatprep.subr.bf16.mxu0 %v1442_v9 }
 0x3ca   :  { %v289_v45 = vpop.f32.mrb[4].mxu0 }
 0x3cb   :  { %v1246_v46 = vpop.f32.mrb[5].mxu0  ;;  %v295_v47 = vmul.f32 %v289_v45, %v289_v45 }
 0x3cc   :  { %v292_v48 = vpop.f32.mrb[6].mxu0  ;;  %v1380_v46 = vld [vmem:[%s1757_s5 + $0xa0] sm:$0xff]  }
 0x3cd   :  { %v1247_v49 = vpop.f32.mrb[7].mxu0  ;;  %v296_v50 = vsel %vm122_vm3, %v295_v47, 0.0  ;;  %v1381_v47 = vld [vmem:[%s1757_s5 + $0xa8] sm:$0xff]   ;;  %v1382_v48 = vld [vmem:[%s1757_s5 + $0xb0] sm:$0xff]  }
 0x3ce   :  { %297 = vadd.xlane.f32.xlu1 %v296_v50  ;;  %v1383_v49 = vld [vmem:[%s1757_s5 + $0xb8] sm:$0xff]  }
 0x45b   :  { %v298_v51 = vpop.xlane.xlu1 %297 }
 0x45c   :  { %v299_v52 = vadd.f32 1e-08, %v298_v51 }
 0x45e   :  { %1402 = vrsqrt.f32 %v299_v52 }
 0x468   :  { %v1403_v53 = vpop.eup %1402 }
 0x469   :  { %v301_v54 = vmul.f32 %v1403_v53, %v289_v45  ;;  %v1379_v45 = vld [vmem:[%s1757_s5 + $0x98] sm:$0xff]  }
 0x46b   :  { %v303_v56 = vsub.f32 %v301_v54, %v128_v36 }
 0x46d   :  { %v310_v57 = vmul.f32 %v1049_v55, %v303_v56 }
 0x46f   :  { %v311_v58 = vadd.f32 %v310_v57, %v128_v36  ;;  %v1375_v36 = vld [vmem:[%s1756_s4 + $0x28] sm:$0xff]  }
 0x470   :  { %1279 = vmatpush3.bf16.msra.mxu0 %v1375_v36 }
 0x471   :  { %v312_v59 = vmul.f32 %v311_v58, %v311_v58  ;;  %1284 = vmatprep.subr.bf16.mxu0 %v1442_v9 }
 0x473   :  { %v313_v60 = vsel %vm122_vm3, %v312_v59, 0.0 }
 0x474   :  { %314 = vadd.xlane.f32.xlu1 %v313_v60 }
 0x501   :  { %v315_v63 = vpop.xlane.xlu1 %314 }
 0x502   :  { %v316_v0 = vadd.f32 1e-08, %v315_v63 }
 0x504   :  { %1404 = vrsqrt.f32 %v316_v0 }
 0x50e   :  { %v1405_v1 = vpop.eup %1404 }
 0x50f   :  { %v318_v2 = vmul.f32 %v1405_v1, %v311_v58 }
 0x511   :  { %v319_v4 = vpack.c.bf16 %v318_v2, %v318_v2 }
 0x513   :  { %1253 = vmatmul.mubr.msk.bf16.vlgmr.msra.gmra.mrb[4].mxu1 %vm122_vm3, %v319_v4 }
 0x514   :  { %1257 = vmatpush3.bf16.msra.mxu1 %v1366_v3  ;;  %1272 = vmatprep.mubr.msk.bf16.mxu1 %vm1444_vm2, %v1442_v9 }
 0x515   :  { %1258 = vmatprep.subr.bf16.mxu1 %v1442_v9 }
 0x518   :  { %1259 = vmatpush3.bf16.msra.mxu1 %v1367_v5 }
 0x519   :  { %1260 = vmatprep.subr.bf16.mxu1 %v1442_v9 }
 0x51c   :  { %1261 = vmatpush3.bf16.msra.mxu1 %v1368_v6 }
 0x51d   :  { %1262 = vmatprep.subr.bf16.mxu1 %v1442_v9 }
 0x520   :  { %1263 = vmatpush3.bf16.msra.mxu1 %v1369_v7 }
 0x521   :  { %1264 = vmatprep.subr.bf16.mxu1 %v1442_v9 }
 0x524   :  { %1265 = vmatpush3.bf16.msra.mxu1 %v1370_v8  ;;  %v1384_v8 = vld [vmem:[%s1756_s4 + $0x30] sm:$0xff]  }
 0x525   :  { %1266 = vmatprep.subr.bf16.mxu1 %v1442_v9 }
 0x528   :  { %1267 = vmatpush3.bf16.msra.mxu1 %v1371_v10  ;;  %v1385_v10 = vld [vmem:[%s1756_s4 + $0x38] sm:$0xff]  }
 0x529   :  { %1268 = vmatprep.subr.bf16.mxu1 %v1442_v9 }
 0x52c   :  { %1269 = vmatpush3.bf16.msra.mxu1 %v1372_v11 }
 0x52d   :  { %1270 = vmatprep.subr.bf16.mxu1 %v1442_v9 }
 0x530   :  { %1271 = vmatpush3.bf16.msra.mxu1 %v1373_v12 }
 0x531   :  { %1304 = vmatprep.subr.bf16.mxu1 %v1442_v9 }
 0x5e6   :  { %v374_v13 = vpop.f32.mrb[4].mxu1 }
 0x5e7   :  { %v380_v14 = vmax.f32 %v374_v13, 0.0  ;;  %v1254_v15 = vpop.f32.mrb[5].mxu1 }
 0x5e8   :  { %v377_v16 = vpop.f32.mrb[6].mxu1  ;;  %v1386_v15 = vld [vmem:[%s1757_s5 + $0xc0] sm:$0xff]  }
 0x5e9   :  { %v381_v17 = vpack.c.bf16 %v380_v14, %v380_v14  ;;  %v1255_v18 = vpop.f32.mrb[7].mxu1 }
 0x5ea   :  { %v1388_v18 = vld [vmem:[%s1757_s5 + $0xd0] sm:$0xff]  }
 0x5eb   :  { %1273 = vmatmul.mubr.bf16.vlgmr.msra.gmra.mrb[8].mxu1 %v381_v17  ;;  %v1387_v17 = vld [vmem:[%s1757_s5 + $0xc8] sm:$0xff]  }
 0x5ec   :  { %1308 = vmatprep.mubr.msk.bf16.mxu1 %vm1444_vm2, %v1442_v9  ;;  %1305 = vmatpush3.bf16.msra.mxu1 %v1384_v8 }
 0x5ed   :  { %1306 = vmatprep.subr.bf16.mxu1 %v1442_v9 }
 0x5f0   :  { %1307 = vmatpush3.bf16.msra.mxu1 %v1385_v10 }
 0x5f1   :  { %1312 = vmatprep.subr.bf16.mxu1 %v1442_v9 }
 0x6be   :  { %v481_v19 = vpop.f32.mrb[8].mxu1 }
 0x6bf   :  { %v487_v20 = vmul.f32 %v481_v19, %v481_v19  ;;  %v1274_v21 = vpop.f32.mrb[9].mxu1 }
 0x6c0   :  { %v484_v22 = vpop.f32.mrb[10].mxu1  ;;  %v1391_v21 = vld [vmem:[%s1757_s5 + $0xe8] sm:$0xff]  }
 0x6c1   :  { %v1275_v23 = vpop.f32.mrb[11].mxu1  ;;  %v488_v24 = vsel %vm122_vm3, %v487_v20, 0.0  ;;  %v1390_v20 = vld [vmem:[%s1757_s5 + $0xe0] sm:$0xff]   ;;  %v1392_v22 = vld [vmem:[%s1757_s5 + $0xf0] sm:$0xff]  }
 0x6c2   :  { %489 = vadd.xlane.f32.xlu0 %v488_v24  ;;  %v1393_v23 = vld [vmem:[%s1757_s5 + $0xf8] sm:$0xff]  }
 0x74f   :  { %v490_v25 = vpop.xlane.xlu0 %489 }
 0x750   :  { %v491_v26 = vadd.f32 1e-08, %v490_v25 }
 0x752   :  { %1406 = vrsqrt.f32 %v491_v26 }
 0x75c   :  { %v1407_v27 = vpop.eup %1406 }
 0x75d   :  { %v493_v28 = vmul.f32 %v1407_v27, %v481_v19  ;;  %v1389_v19 = vld [vmem:[%s1757_s5 + $0xd8] sm:$0xff]  }
 0x75f   :  { %v496_v30 = vsub.f32 %v493_v28, %v318_v2 }
 0x761   :  { %v503_v31 = vmul.f32 %v1082_v29, %v496_v30 }
 0x763   :  { %v504_v32 = vadd.f32 %v503_v31, %v318_v2  ;;  %v1115_v2 = vld [vmem:[%s1758_s6 + $0x2] ss:$0 sm:$0xff] }
 0x765   :  { %v505_v33 = vmul.f32 %v504_v32, %v504_v32 }
 0x767   :  { %v506_v34 = vsel %vm122_vm3, %v505_v33, 0.0 }
 0x768   :  { %507 = vadd.xlane.f32.xlu1 %v506_v34 }
 0x7f5   :  { %v508_v37 = vpop.xlane.xlu1 %507 }
 0x7f6   :  { %v509_v38 = vadd.f32 1e-08, %v508_v37 }
 0x7f8   :  { %1408 = vrsqrt.f32 %v509_v38 }
 0x802   :  { %v1409_v39 = vpop.eup %1408 }
 0x803   :  { %v511_v40 = vmul.f32 %v1409_v39, %v504_v32 }
 0x805   :  { %v512_v42 = vpack.c.bf16 %v511_v40, %v511_v40 }
 0x807   :  { %1281 = vmatmul.mubr.msk.bf16.vlgmr.msra.gmra.mrb[8].mxu0 %vm122_vm3, %v512_v42 }
 0x808   :  { %1285 = vmatpush3.bf16.msra.mxu0 %v1376_v41  ;;  %1300 = vmatprep.mubr.msk.bf16.mxu0 %vm1444_vm2, %v1442_v9 }
 0x809   :  { %1286 = vmatprep.subr.bf16.mxu0 %v1442_v9 }
 0x80c   :  { %1287 = vmatpush3.bf16.msra.mxu0 %v1377_v43 }
 0x80d   :  { %1288 = vmatprep.subr.bf16.mxu0 %v1442_v9 }
 0x810   :  { %1289 = vmatpush3.bf16.msra.mxu0 %v1378_v44 }
 0x811   :  { %1290 = vmatprep.subr.bf16.mxu0 %v1442_v9 }
 0x814   :  { %1291 = vmatpush3.bf16.msra.mxu0 %v1379_v45 }
 0x815   :  { %1292 = vmatprep.subr.bf16.mxu0 %v1442_v9 }
 0x818   :  { %1293 = vmatpush3.bf16.msra.mxu0 %v1380_v46  ;;  %v1394_v46 = vld [vmem:[%s1759_s7] sm:$0xff]  }
 0x819   :  { %1294 = vmatprep.subr.bf16.mxu0 %v1442_v9 }
 0x81c   :  { %1295 = vmatpush3.bf16.msra.mxu0 %v1381_v47  ;;  %v1395_v47 = vld [vmem:[%s1759_s7 + $0x8] sm:$0xff]   ;;  %s1445_s7 = smov [#allocation2]  }
 0x81d   :  { %1296 = vmatprep.subr.bf16.mxu0 %v1442_v9  ;;  %s1025_s12 = sshll.u32 %s1445_s7, 4  ;;  %s1026_s12 = int_to_ptr.vmem [resolvable:$true] %s1025_s12 }
 0x81e   :  { %p1423_p1 = scmp.lt.s32.totalorder %s1026_s12, %s1026_s12 }
 0x820   :  { %1297 = vmatpush3.bf16.msra.mxu0 %v1382_v48 }
 0x821   :  { %1298 = vmatprep.subr.bf16.mxu0 %v1442_v9 }
 0x824   :  { %1299 = vmatpush3.bf16.msra.mxu0 %v1383_v49 }
 0x825   :  { %1332 = vmatprep.subr.bf16.mxu0 %v1442_v9 }
 0x8da   :  { %v567_v50 = vpop.f32.mrb[8].mxu0 }
 0x8db   :  { %v573_v51 = vmax.f32 %v567_v50, 0.0  ;;  %v1282_v52 = vpop.f32.mrb[9].mxu0 }
 0x8dc   :  { %v570_v53 = vpop.f32.mrb[10].mxu0  ;;  %v1396_v52 = vld [vmem:[%s1760_s8] sm:$0xff]  }
 0x8dd   :  { %v574_v54 = vpack.c.bf16 %v573_v51, %v573_v51  ;;  %v1283_v55 = vpop.f32.mrb[11].mxu0 }
 0x8df   :  { %1301 = vmatmul.mubr.bf16.vlgmr.msra.gmra.mrb[12].mxu0 %v574_v54  ;;  %v1397_v54 = vld [vmem:[%s1760_s8 + $0x8] sm:$0xff]   ;;  %s1418_s8 = scalar_lea.vmem %s1026_s12, 128 }
 0x8e0   :  { %1336 = vmatprep.mubr.msk.bf16.mxu0 %vm1444_vm2, %v1442_v9  ;;  %1333 = vmatpush3.bf16.msra.mxu0 %v1394_v46  ;;  %p1419_p0 = scmp.ne.s32.totalorder %s1026_s12, %s1418_s8  ;;  %p1424_p2 = scmp.lt.s32.totalorder %s1418_s8, %s1418_s8 }
 0x8e1   :  { %1334 = vmatprep.subr.bf16.mxu0 %v1442_v9 }
 0x8e2   :  { %p1425_p3 = por %p1424_p2, %p1423_p1 }
 0x8e4   :  { %1335 = vmatpush3.bf16.msra.mxu0 %v1395_v47  ;;  %p1426_p4 = pnand %p1425_p3, %p1419_p0 }
 0x8e5   :  { %1340 = vmatprep.subr.bf16.mxu0 %v1442_v9 }
 0x9b2   :  { %v674_v56 = vpop.f32.mrb[12].mxu0 }
 0x9b3   :  { %v680_v57 = vmul.f32 %v674_v56, %v674_v56  ;;  %v1302_v58 = vpop.f32.mrb[13].mxu0 }
 0x9b4   :  { %v677_v59 = vpop.f32.mrb[14].mxu0 }
 0x9b5   :  { %v1303_v60 = vpop.f32.mrb[15].mxu0  ;;  %v681_v61 = vsel %vm122_vm3, %v680_v57, 0.0 }
 0x9b6   :  { %682 = vadd.xlane.f32.xlu0 %v681_v61 }
 0xa43   :  { %v683_v62 = vpop.xlane.xlu0 %682 }
 0xa44   :  { %v684_v63 = vadd.f32 1e-08, %v683_v62 }
 0xa46   :  { %1410 = vrsqrt.f32 %v684_v63 }
 0xa50   :  { %v1411_v0 = vpop.eup %1410 }
 0xa51   :  { %v686_v1 = vmul.f32 %v1411_v0, %v674_v56 }
 0xa53   :  { %v689_v3 = vsub.f32 %v686_v1, %v511_v40 }
 0xa55   :  { %v696_v4 = vmul.f32 %v1115_v2, %v689_v3 }
 0xa57   :  { %v697_v5 = vadd.f32 %v696_v4, %v511_v40  ;;  %v1148_v40 = vld [vmem:[%s1758_s6 + $0x3] ss:$0 sm:$0xff] }
 0xa59   :  { %v698_v6 = vmul.f32 %v697_v5, %v697_v5 }
 0xa5b   :  { %v699_v7 = vsel %vm122_vm3, %v698_v6, 0.0 }
 0xa5c   :  { %700 = vadd.xlane.f32.xlu1 %v699_v7 }
 0xae9   :  { %v701_v11 = vpop.xlane.xlu1 %700 }
 0xaea   :  { %v702_v12 = vadd.f32 1e-08, %v701_v11 }
 0xaec   :  { %1412 = vrsqrt.f32 %v702_v12 }
 0xaf6   :  { %v1413_v13 = vpop.eup %1412 }
 0xaf7   :  { %v704_v14 = vmul.f32 %v1413_v13, %v697_v5 }
 0xaf9   :  { %v705_v16 = vpack.c.bf16 %v704_v14, %v704_v14 }
 0xafb   :  { %1309 = vmatmul.mubr.msk.bf16.vlgmr.msra.gmra.mrb[12].mxu1 %vm122_vm3, %v705_v16 }
 0xafc   :  { %1313 = vmatpush3.bf16.msra.mxu1 %v1386_v15  ;;  %1328 = vmatprep.mubr.msk.bf16.mxu1 %vm1444_vm2, %v1442_v9 }
 0xafd   :  { %1314 = vmatprep.subr.bf16.mxu1 %v1442_v9 }
 0xb00   :  { %1315 = vmatpush3.bf16.msra.mxu1 %v1387_v17 }
 0xb01   :  { %1316 = vmatprep.subr.bf16.mxu1 %v1442_v9 }
 0xb04   :  { %1317 = vmatpush3.bf16.msra.mxu1 %v1388_v18 }
 0xb05   :  { %1318 = vmatprep.subr.bf16.mxu1 %v1442_v9 }
 0xb08   :  { %1319 = vmatpush3.bf16.msra.mxu1 %v1389_v19 }
 0xb09   :  { %1320 = vmatprep.subr.bf16.mxu1 %v1442_v9 }
 0xb0c   :  { %1321 = vmatpush3.bf16.msra.mxu1 %v1390_v20 }
 0xb0d   :  { %1322 = vmatprep.subr.bf16.mxu1 %v1442_v9 }
 0xb10   :  { %1323 = vmatpush3.bf16.msra.mxu1 %v1391_v21 }
 0xb11   :  { %1324 = vmatprep.subr.bf16.mxu1 %v1442_v9 }
 0xb14   :  { %1325 = vmatpush3.bf16.msra.mxu1 %v1392_v22 }
 0xb15   :  { %1326 = vmatprep.subr.bf16.mxu1 %v1442_v9 }
 0xb18   :  { %1327 = vmatpush3.bf16.msra.mxu1 %v1393_v23 }
 0xbce   :  { %v760_v24 = vpop.f32.mrb[12].mxu1 }
 0xbcf   :  { %v766_v25 = vmax.f32 %v760_v24, 0.0  ;;  %v1310_v26 = vpop.f32.mrb[13].mxu1 }
 0xbd0   :  { %v763_v27 = vpop.f32.mrb[14].mxu1 }
 0xbd1   :  { %v767_v28 = vpack.c.bf16 %v766_v25, %v766_v25  ;;  %v1311_v29 = vpop.f32.mrb[15].mxu1 }
 0xbd3   :  { %1329 = vmatmul.mubr.bf16.vlgmr.msra.gmra.mrb[16].mxu1 %v767_v28 }
 0xca6   :  { %v867_v30 = vpop.f32.mrb[16].mxu1 }
 0xca7   :  { %v873_v31 = vmul.f32 %v867_v30, %v867_v30  ;;  %v1330_v32 = vpop.f32.mrb[17].mxu1 }
 0xca8   :  { %v870_v33 = vpop.f32.mrb[18].mxu1 }
 0xca9   :  { %v1331_v34 = vpop.f32.mrb[19].mxu1  ;;  %v874_v35 = vsel %vm122_vm3, %v873_v31, 0.0 }
 0xcaa   :  { %875 = vadd.xlane.f32.xlu0 %v874_v35 }
 0xd37   :  { %v876_v36 = vpop.xlane.xlu0 %875 }
 0xd38   :  { %v877_v37 = vadd.f32 1e-08, %v876_v36 }
 0xd3a   :  { %1414 = vrsqrt.f32 %v877_v37 }
 0xd44   :  { %v1415_v38 = vpop.eup %1414 }
 0xd45   :  { %v879_v39 = vmul.f32 %v1415_v38, %v867_v30 }
 0xd47   :  { %v882_v41 = vsub.f32 %v879_v39, %v704_v14 }
 0xd49   :  { %v889_v42 = vmul.f32 %v1148_v40, %v882_v41 }
 0xd4b   :  { %v890_v43 = vadd.f32 %v889_v42, %v704_v14 }
 0xd4d   :  { %v891_v44 = vmul.f32 %v890_v43, %v890_v43 }
 0xd4f   :  { %v892_v45 = vsel %vm122_vm3, %v891_v44, 0.0 }
 0xd50   :  { %893 = vadd.xlane.f32.xlu1 %v892_v45 }
 0xddd   :  { %v894_v48 = vpop.xlane.xlu1 %893 }
 0xdde   :  { %v895_v49 = vadd.f32 1e-08, %v894_v48 }
 0xde0   :  { %1416 = vrsqrt.f32 %v895_v49 }
 0xdea   :  { %v1417_v50 = vpop.eup %1416 }
 0xdeb   :  { %v897_v51 = vmul.f32 %v1417_v50, %v890_v43 }
 0xded   :  { %v898_v53 = vpack.c.bf16 %v897_v51, %v897_v51 }
 0xdef   :  { %1337 = vmatmul.mubr.msk.bf16.vlgmr.msra.gmra.mrb[16].mxu0 %vm122_vm3, %v898_v53 }
 0xdf0   :  { %1341 = vmatpush3.bf16.msra.mxu0 %v1396_v52  ;;  %1344 = vmatprep.mubr.msk.bf16.mxu0 %vm1444_vm2, %v1442_v9 }
 0xdf1   :  { %1342 = vmatprep.subr.bf16.mxu0 %v1442_v9 }
 0xdf4   :  { %1343 = vmatpush3.bf16.msra.mxu0 %v1397_v54 }
 0xec2   :  { %v952_v55 = vpop.f32.mrb[16].mxu0 }
 0xec3   :  { %v958_v56 = vpack.c.bf16 %v952_v55, %v952_v55  ;;  %v1338_v57 = vpop.f32.mrb[17].mxu0 }
 0xec4   :  { %v955_v58 = vpop.f32.mrb[18].mxu0 }
 0xec5   :  { %v1339_v59 = vpop.f32.mrb[19].mxu0  ;;  %1345 = vmatmul.mubr.msk.bf16.vlgmr.msra.gmra.mrb[20].mxu0 %vm122_vm3, %v958_v56 }
 0xf98   :  { %v1012_v60 = vpop.f32.mrb[20].mxu0 }
 0xf99   :  { %1018 = vst [vmem:[#allocation2] sm:$0xff] %v1012_v60  ;;  %v1346_v61 = vpop.f32.mrb[21].mxu0 }
 0xf9a   :  { %v1015_v62 = vpop.f32.mrb[22].mxu0 }
 0xf9b   :  { %1429 = shalt.err (!%p1426_p4)
}
 0xf9c   :  { %s1430_s15 = scalar_lea.hbm %s1761_s9, 128 }
 0xf9d   :  { %p1431_p5 = scmp.ne.s32.totalorder %s1761_s9, %s1430_s15  ;;  %p1434_p6 = scmp.lt.u32.totalorder %s1430_s15, %s1761_s9 }
 0xf9f   :  { %p1436_p7 = pnand %p1434_p6, %p1431_p5 }
 0xfa1   :  { %1439 = shalt.err (!%p1436_p7)
}
 0xfa2   :  { %1028 = dma.vmem_to_hbm [thread:$0]  %s1026_s12, 128, %s1761_s9, [#allocation3]   ;;  %v1347_v9 = vpop.f32.mrb[23].mxu0 }
 0xfa3   :  { %1440 = dma.done.wait [#allocation3], 128  }
 0xfa4   :  { %1441 = vsyncadd [#allocation3], 4294967168 }
 0xfa5   :  { %1032 = vsyncpa [#allocation3], 1 }

</bundles_post_ra>
